<compile_context>
chip_gen: v5e
topology: v5e:2x2
jax: 0.10.0
libtpu: 0.0.40
codegen_flags: <defaults>
</compile_context>

<pallas_src>
import functools
from typing import Literal

import jax
import jax.numpy as jnp
from jax import lax
from jax.experimental import pallas as pl
from jax.experimental.pallas import tpu as pltpu


# ---------------------------------------------------------------------------
# Kernel bodies
# ---------------------------------------------------------------------------

def _pack_sums(loss_sum, dp_sum, dn_sum):
    """Pack three f32 scalars into lanes 0..2 of a single (8, 128) tile."""
    lane = lax.broadcasted_iota(jnp.int32, (8, 128), 1)
    return (jnp.where(lane == 0, loss_sum, 0.0)
            + jnp.where(lane == 1, dp_sum, 0.0)
            + jnp.where(lane == 2, dn_sum, 0.0))


def _tile_sums(e_ref, *, margin, third, tile_t):
    """Per-tile sums of loss / positive-distance / negative-distance."""
    a = e_ref[0].astype(jnp.float32)   # (TILE_T, D) anchors
    p = e_ref[1].astype(jnp.float32)   # (TILE_T, D) positives
    n = e_ref[2].astype(jnp.float32)   # (TILE_T, D) negatives

    diff_p = a - p
    diff_n = a - n
    # TODO(synk): add eps inside sqrt if a backward pass is ever derived
    #             (identical anchor/positive rows give NaN gradients).
    dp = jnp.sqrt(jnp.sum(diff_p * diff_p, axis=1, keepdims=True))
    dn = jnp.sqrt(jnp.sum(diff_n * diff_n, axis=1, keepdims=True))
    losses = jnp.maximum(dp - dn + margin, 0.0)

    if third % tile_t != 0:
        # Mask garbage rows of the (partial) last tile before any reduction;
        # jnp.where select semantics also neutralize NaN/Inf from OOB data.
        rows = pl.program_id(0) * tile_t + lax.broadcasted_iota(
            jnp.int32, (tile_t, 1), 0)
        valid = rows < third
        dp = jnp.where(valid, dp, 0.0)
        dn = jnp.where(valid, dn, 0.0)
        losses = jnp.where(valid, losses, 0.0)

    return jnp.sum(losses), jnp.sum(dp), jnp.sum(dn)


def _triplet_kernel_two_stage(e_ref, out_ref, *, margin, third, tile_t):
    loss_sum, dp_sum, dn_sum = _tile_sums(
        e_ref, margin=margin, third=third, tile_t=tile_t)
    out_ref[...] = _pack_sums(loss_sum, dp_sum, dn_sum)[None]


def _triplet_kernel_accum(e_ref, out_ref, *, margin, third, tile_t):
    i = pl.program_id(0)

    @pl.when(i == 0)
    def _():
        out_ref[...] = jnp.zeros_like(out_ref)

    loss_sum, dp_sum, dn_sum = _tile_sums(
        e_ref, margin=margin, third=third, tile_t=tile_t)
    out_ref[...] += _pack_sums(loss_sum, dp_sum, dn_sum)

    @pl.when(i == pl.num_programs(0) - 1)
    def _():
        out_ref[...] = out_ref[...] * jnp.float32(1.0 / third)


# ---------------------------------------------------------------------------
# Tile sizing / hardware queries
# ---------------------------------------------------------------------------

_DEFAULT_VMEM_BYTES = 64 << 20   # smallest per-TensorCore VMEM (v7x)
_MIN_GRID_STEPS = 4              # 2x pipeline depth: overlap + v7x megacore


def _vmem_budget():
    """Returns (working-set byte budget for tile sizing, vmem_limit_bytes)."""
    phys = _DEFAULT_VMEM_BYTES
    try:
        cap = getattr(pltpu.get_tpu_info(), "vmem_capacity_bytes", None)
        if cap:
            phys = int(cap)
    except Exception:
        pass
    # Keep the working set <= ~70% of per-TC VMEM and never above 48 MiB
    # (safe on v7x's 64 MiB; v5e/v6e have 128 MiB physical so 48 MiB is ample
    # — the kernel is HBM-bound, bigger tiles buy nothing past this point).
    budget = min(int(phys * 0.70), 48 << 20)
    limit = min(phys, budget + (8 << 20))
    return budget, limit


def _choose_tile_t(third: int, dim: int, dtype, budget_bytes: int) -> int:
    """Largest batch tile whose fused, double-buffered blocks + f32 compute
    temporaries fit the VMEM budget, clamped to give >= _MIN_GRID_STEPS."""
    itemsize = jnp.dtype(dtype).itemsize
    # Fused (3, TILE_T, D) input block, double-buffered by the pipeline.
    per_row_pipeline = 2 * 3 * dim * itemsize
    # f32 compute temporaries: a/p/n upcasts (for sub-f32 inputs) + two diffs.
    per_row_compute = (5 if itemsize < 4 else 3) * dim * 4
    per_row = per_row_pipeline + per_row_compute

    # Sublane packing granularity: 8 (f32), 16 (bf16), 32 (int8 / fp8).
    sub = max(8, 32 // itemsize)

    t_budget = max(sub, (budget_bytes // per_row) // sub * sub)

    # Clamp so the grid has >= _MIN_GRID_STEPS steps when the batch allows it.
    t_steps = -(-third // _MIN_GRID_STEPS)            # ceil-div
    t_steps = max(sub, -(-t_steps // sub) * sub)      # round UP to sublane mult

    t = min(t_budget, t_steps)
    if t >= third:
        return third   # single full-extent block (always layout-legal)
    return t
    # TODO(synk): for extreme embedding dims (D >~ 100K) add a second grid
    # axis over D with a running sum-of-squares accumulator.


def _default_reduction(num_tiles: int) -> str:
    if num_tiles <= 1:
        return "accumulate"   # nothing to shard/pipeline; skip 2nd-stage op
    try:
        kind = jax.devices()[0].device_kind.lower()
    except Exception:
        return "two_stage"
    # Single-TensorCore parts get nothing from a "parallel" grid: accumulate
    # in-kernel (saves per-tile writeback + a separate tiny XLA reduce).
    if any(tag in kind for tag in
           ("v5e", "v5 lite", "v5lite", "v6e", "v6 lite", "v6lite")):
        return "accumulate"
    return "two_stage"        # v7x / unknown: keep megacore sharding


# ---------------------------------------------------------------------------
# Public wrapper
# ---------------------------------------------------------------------------

def triplet_loss_offline(
        embeddings: jax.Array, margin: float = 1.0, *,
        tile_t: int | None = None,
        reduction: Literal["auto", "two_stage", "accumulate"] = "auto"):
    """JAX/Pallas equivalent of TripletLossOffline.forward.

    Returns (loss, mean_positive_distance, mean_negative_distance) as f32.
    """
    batch, dim = embeddings.shape
    if batch <= 0 or batch % 3 != 0:
        raise ValueError("batch size must be a positive multiple of 3")
    third = batch // 3

    # Free, contiguous reshape: [anchors | positives | negatives] row blocks.
    emb3 = embeddings.reshape(3, third, dim)

    budget_bytes, vmem_limit = _vmem_budget()
    if tile_t is None:
        tile_t = _choose_tile_t(third, dim, embeddings.dtype, budget_bytes)
    tile_t = min(tile_t, third)
    num_tiles = pl.cdiv(third, tile_t)

    if reduction == "auto":
        reduction = _default_reduction(num_tiles)

    # One fused input pipeline: a single strided DMA per grid step.
    in_specs = [pl.BlockSpec((3, tile_t, dim), lambda i: (0, i, 0))]

    if reduction == "accumulate":
        kernel = functools.partial(_triplet_kernel_accum, margin=float(margin),
                                   third=third, tile_t=tile_t)
        out = pl.pallas_call(
            kernel,
            grid_spec=pltpu.PrefetchScalarGridSpec(
                num_scalar_prefetch=0,
                grid=(num_tiles,),
                in_specs=in_specs,
                out_specs=pl.BlockSpec((8, 128), lambda i: (0, 0)),
            ),
            out_shape=jax.ShapeDtypeStruct((8, 128), jnp.float32),
            compiler_params=pltpu.CompilerParams(
                dimension_semantics=("arbitrary",),
                vmem_limit_bytes=vmem_limit),
        )(emb3)
        return out[0, 0], out[0, 1], out[0, 2]

    # Two-stage form: per-tile partial sums on a "parallel" grid.
    kernel = functools.partial(_triplet_kernel_two_stage, margin=float(margin),
                               third=third, tile_t=tile_t)
    partials = pl.pallas_call(
        kernel,
        grid_spec=pltpu.PrefetchScalarGridSpec(
            num_scalar_prefetch=0,
            grid=(num_tiles,),
            in_specs=in_specs,
            out_specs=pl.BlockSpec((1, 8, 128), lambda i: (i, 0, 0)),
        ),
        out_shape=jax.ShapeDtypeStruct((num_tiles, 8, 128), jnp.float32),
        compiler_params=pltpu.CompilerParams(
            dimension_semantics=("parallel",),
            vmem_limit_bytes=vmem_limit),
    )(emb3)

    sums = partials[:, 0, :3].sum(axis=0) / jnp.float32(third)
    return sums[0], sums[1], sums[2]


# ---------------------------------------------------------------------------
# Reference + tests
# ---------------------------------------------------------------------------

def _reference(embeddings, margin=1.0):
    third = embeddings.shape[0] // 3
    a = embeddings[:third].astype(jnp.float32)
    p = embeddings[third:2 * third].astype(jnp.float32)
    n = embeddings[2 * third:3 * third].astype(jnp.float32)
    dp = jnp.linalg.norm(a - p, axis=1)
    dn = jnp.linalg.norm(a - n, axis=1)
    losses = jax.nn.relu(dp - dn + margin).mean()
    return losses, dp.mean(), dn.mean()


if __name__ == "__main__":
    # Test 1: tiny single-block case (2 triplets, D=32), auto path.
    emb1 = jax.random.normal(jax.random.PRNGKey(0), (6, 32), dtype=jnp.float32)
    out1 = triplet_loss_offline(emb1, margin=1.0)
    jax.block_until_ready(out1)
    ref1 = _reference(emb1, margin=1.0)
    for got, want in zip(out1, ref1):
        assert jnp.allclose(got, want, atol=1e-5, rtol=1e-5), (got, want)

    # Test 2: tiled path with a masked remainder tile (third=20, tile_t=8),
    # exercising BOTH reduction strategies.
    emb2 = jax.random.normal(jax.random.PRNGKey(1), (60, 128), dtype=jnp.float32)
    ref2 = _reference(emb2, margin=0.5)
    for mode in ("two_stage", "accumulate"):
        out2 = triplet_loss_offline(emb2, margin=0.5, tile_t=8, reduction=mode)
        jax.block_until_ready(out2)
        for got, want in zip(out2, ref2):
            assert jnp.allclose(got, want, atol=1e-5, rtol=1e-5), (mode, got, want)

    # Test 3: automatic tile sizing on a moderate shape (third=128, D=256);
    # the step-count clamp should produce a multi-step pipelined grid.
    emb3 = jax.random.normal(jax.random.PRNGKey(2), (384, 256), dtype=jnp.float32)
    out3 = triplet_loss_offline(emb3, margin=1.0)
    jax.block_until_ready(out3)
    ref3 = _reference(emb3, margin=1.0)
    for got, want in zip(out3, ref3):
        assert jnp.allclose(got, want, atol=1e-4, rtol=1e-4), (got, want)

    print("KERNEL_OK")
</pallas_src>

<mosaic_0001>
module attributes {stable_mosaic.version = 11 : i64} {
  func.func @_triplet_kernel_accum(%arg0: i32, %arg1: memref<3x2x32xf32, #tpu.memory_space<vmem>>, %arg2: memref<8x128xf32, #tpu.memory_space<vmem>>) attributes {dimension_semantics = [#tpu.dimension_semantics<arbitrary>], iteration_bounds = array<i64: 1>, scalar_prefetch = 0 : i64, scratch_operands = 0 : i64, tpu.core_type = #tpu.core_type<tc>, window_params = [{transform_indices = @transform_0, window_bounds = array<i64: 3, 2, 32>}, {pipeline_mode = #tpu.pipeline_mode<synchronous>, transform_indices = @transform_1, window_bounds = array<i64: 8, 128>}]} {
    %c0_i32 = arith.constant 0 : i32
    %0 = arith.cmpi eq, %arg0, %c0_i32 : i32
    %1 = arith.extui %0 : i1 to i32
    %c0_i32_0 = arith.constant 0 : i32
    %2 = arith.cmpi ne, %1, %c0_i32_0 : i32
    scf.if %2 {
      %cst_23 = arith.constant 0.000000e+00 : f32
      %60 = vector.broadcast %cst_23 : f32 to vector<8x128xf32>
      %c0_24 = arith.constant 0 : index
      %c0_25 = arith.constant 0 : index
      %61 = vector.load %arg2[%c0_24, %c0_25] : memref<8x128xf32, #tpu.memory_space<vmem>>, vector<8x128xf32>
      tpu.vector_store %arg2[%c0_24, %c0_25], %60 {strides = array<i32>} : memref<8x128xf32, #tpu.memory_space<vmem>>, vector<8x128xf32>,
    } else {
    }
    %c0 = arith.constant 0 : index
    %c0_1 = arith.constant 0 : index
    %c0_2 = arith.constant 0 : index
    %3 = vector.load %arg1[%c0, %c0_1, %c0_2] : memref<3x2x32xf32, #tpu.memory_space<vmem>>, vector<1x2x32xf32>
    %4 = vector.shape_cast %3 : vector<1x2x32xf32> to vector<2x32xf32>
    %c1 = arith.constant 1 : index
    %c0_3 = arith.constant 0 : index
    %c0_4 = arith.constant 0 : index
    %5 = vector.load %arg1[%c1, %c0_3, %c0_4] : memref<3x2x32xf32, #tpu.memory_space<vmem>>, vector<1x2x32xf32>
    %6 = vector.shape_cast %5 : vector<1x2x32xf32> to vector<2x32xf32>
    %c2 = arith.constant 2 : index
    %c0_5 = arith.constant 0 : index
    %c0_6 = arith.constant 0 : index
    %7 = vector.load %arg1[%c2, %c0_5, %c0_6] : memref<3x2x32xf32, #tpu.memory_space<vmem>>, vector<1x2x32xf32>
    %8 = vector.shape_cast %7 : vector<1x2x32xf32> to vector<2x32xf32>
    %9 = arith.subf %4, %6 : vector<2x32xf32>
    %10 = arith.subf %4, %8 : vector<2x32xf32>
    %11 = arith.mulf %9, %9 : vector<2x32xf32>
    %cst = arith.constant dense<0.000000e+00> : vector<2xf32>
    %12 = vector.multi_reduction <add>, %11, %cst [1] : vector<2x32xf32> to vector<2xf32>
    %13 = vector.shape_cast %12 : vector<2xf32> to vector<2x1xf32>
    %14 = math.sqrt %13 : vector<2x1xf32>
    %15 = arith.mulf %10, %10 : vector<2x32xf32>
    %cst_7 = arith.constant dense<0.000000e+00> : vector<2xf32>
    %16 = vector.multi_reduction <add>, %15, %cst_7 [1] : vector<2x32xf32> to vector<2xf32>
    %17 = vector.shape_cast %16 : vector<2xf32> to vector<2x1xf32>
    %18 = math.sqrt %17 : vector<2x1xf32>
    %19 = arith.subf %14, %18 : vector<2x1xf32>
    %cst_8 = arith.constant 1.000000e+00 : f32
    %20 = vector.broadcast %cst_8 : f32 to vector<2x1xf32>
    %21 = arith.addf %19, %20 : vector<2x1xf32>
    %cst_9 = arith.constant 0.000000e+00 : f32
    %22 = vector.broadcast %cst_9 : f32 to vector<2x1xf32>
    %23 = arith.maximumf %21, %22 : vector<2x1xf32>
    %24 = vector.shape_cast %23 : vector<2x1xf32> to vector<1x2x1xf32>
    %cst_10 = arith.constant dense<0.000000e+00> : vector<1xf32>
    %25 = vector.multi_reduction <add>, %24, %cst_10 [1, 2] : vector<1x2x1xf32> to vector<1xf32>
    %26 = vector.shape_cast %25 : vector<1xf32> to vector<1x1x1xf32>
    %27 = vector.extract %26[0, 0, 0] : f32 from vector<1x1x1xf32>
    %28 = vector.shape_cast %14 : vector<2x1xf32> to vector<1x2x1xf32>
    %cst_11 = arith.constant dense<0.000000e+00> : vector<1xf32>
    %29 = vector.multi_reduction <add>, %28, %cst_11 [1, 2] : vector<1x2x1xf32> to vector<1xf32>
    %30 = vector.shape_cast %29 : vector<1xf32> to vector<1x1x1xf32>
    %31 = vector.extract %30[0, 0, 0] : f32 from vector<1x1x1xf32>
    %32 = vector.shape_cast %18 : vector<2x1xf32> to vector<1x2x1xf32>
    %cst_12 = arith.constant dense<0.000000e+00> : vector<1xf32>
    %33 = vector.multi_reduction <add>, %32, %cst_12 [1, 2] : vector<1x2x1xf32> to vector<1xf32>
    %34 = vector.shape_cast %33 : vector<1xf32> to vector<1x1x1xf32>
    %35 = vector.extract %34[0, 0, 0] : f32 from vector<1x1x1xf32>
    %c0_13 = arith.constant 0 : index
    %c0_14 = arith.constant 0 : index
    %36 = vector.load %arg2[%c0_13, %c0_14] : memref<8x128xf32, #tpu.memory_space<vmem>>, vector<8x128xf32>
    %37 = tpu.iota {dimensions = array<i32: 1>} : vector<8x128xi32>
    %c0_i32_15 = arith.constant 0 : i32
    %38 = vector.broadcast %c0_i32_15 : i32 to vector<8x128xi32>
    %39 = arith.cmpi eq, %37, %38 : vector<8x128xi32>
    %cst_16 = arith.constant 0.000000e+00 : f32
    %40 = vector.broadcast %27 : f32 to vector<8x128xf32>
    %41 = vector.broadcast %cst_16 : f32 to vector<8x128xf32>
    %42 = arith.select %39, %40, %41 : vector<8x128xi1>, vector<8x128xf32>
    %c1_i32 = arith.constant 1 : i32
    %43 = vector.broadcast %c1_i32 : i32 to vector<8x128xi32>
    %44 = arith.cmpi eq, %37, %43 : vector<8x128xi32>
    %cst_17 = arith.constant 0.000000e+00 : f32
    %45 = vector.broadcast %31 : f32 to vector<8x128xf32>
    %46 = vector.broadcast %cst_17 : f32 to vector<8x128xf32>
    %47 = arith.select %44, %45, %46 : vector<8x128xi1>, vector<8x128xf32>
    %48 = arith.addf %42, %47 : vector<8x128xf32>
    %c2_i32 = arith.constant 2 : i32
    %49 = vector.broadcast %c2_i32 : i32 to vector<8x128xi32>
    %50 = arith.cmpi eq, %37, %49 : vector<8x128xi32>
    %cst_18 = arith.constant 0.000000e+00 : f32
    %51 = vector.broadcast %35 : f32 to vector<8x128xf32>
    %52 = vector.broadcast %cst_18 : f32 to vector<8x128xf32>
    %53 = arith.select %50, %51, %52 : vector<8x128xi1>, vector<8x128xf32>
    %54 = arith.addf %48, %53 : vector<8x128xf32>
    %55 = arith.addf %36, %54 : vector<8x128xf32>
    %c0_19 = arith.constant 0 : index
    %c0_20 = arith.constant 0 : index
    %56 = vector.load %arg2[%c0_19, %c0_20] : memref<8x128xf32, #tpu.memory_space<vmem>>, vector<8x128xf32>
    tpu.vector_store %arg2[%c0_19, %c0_20], %55 {strides = array<i32>} : memref<8x128xf32, #tpu.memory_space<vmem>>, vector<8x128xf32>,
    %c0_i32_21 = arith.constant 0 : i32
    %57 = arith.cmpi eq, %arg0, %c0_i32_21 : i32
    %58 = arith.extui %57 : i1 to i32
    %c0_i32_22 = arith.constant 0 : i32
    %59 = arith.cmpi ne, %58, %c0_i32_22 : i32
    scf.if %59 {
      %c0_23 = arith.constant 0 : index
      %c0_24 = arith.constant 0 : index
      %60 = vector.load %arg2[%c0_23, %c0_24] : memref<8x128xf32, #tpu.memory_space<vmem>>, vector<8x128xf32>
      %cst_25 = arith.constant 5.000000e-01 : f32
      %61 = vector.broadcast %cst_25 : f32 to vector<8x128xf32>
      %62 = arith.mulf %60, %61 : vector<8x128xf32>
      %c0_26 = arith.constant 0 : index
      %c0_27 = arith.constant 0 : index
      %63 = vector.load %arg2[%c0_26, %c0_27] : memref<8x128xf32, #tpu.memory_space<vmem>>, vector<8x128xf32>
      tpu.vector_store %arg2[%c0_26, %c0_27], %62 {strides = array<i32>} : memref<8x128xf32, #tpu.memory_space<vmem>>, vector<8x128xf32>,
    } else {
    }
    return
  }
  func.func @transform_0(%arg0: i32) -> (i32, i32, i32) {
    %c0_i32 = arith.constant 0 : i32
    %c0_i32_0 = arith.constant 0 : i32
    %c0_i32_1 = arith.constant 0 : i32
    return %c0_i32, %arg0, %c0_i32_0 : i32, i32, i32
  }
  func.func @transform_1(%arg0: i32) -> (i32, i32) {
    %c0_i32 = arith.constant 0 : i32
    %c0_i32_0 = arith.constant 0 : i32
    %c0_i32_1 = arith.constant 0 : i32
    return %c0_i32, %c0_i32_0 : i32, i32
  }
}

</mosaic_0001>

<bundles_post_ra>
// kernel: tpu_custom_call.1
= control target key start
LH: loop header
LB: loop body
LE: loop exit
PB: predicated region body
PF: predicated region fallthrough
CT: control target
= control target key end

     0   :  { %6 = vsyncpa [#allocation3], 0  ;;  %s230_s0 = inlined_call_operand.hbm [shape: f32[3,2,32], index: 0, kind: input, shape index: {}]   ;;  %s231_s1 = inlined_call_operand.hbm [shape: f32[8,128], index: 1, kind: output, shape index: {}]  }
   0x1   :  { %7 = vsyncpa [#allocation4], 0  ;;  %s12_s8 = sshll.u32 %s230_s0, 4  ;;  %s210_s9 = smov [#allocation2]   ;;  %s13_s8 = int_to_ptr.hbm [resolvable:$true] %s12_s8 }
   0x2   :  { %s14_s10 = sshll.u32 %s210_s9, 4  ;;  %s211_s11 = smov 32   ;;  %s15_s10 = int_to_ptr.vmem [resolvable:$true] %s14_s10 }
   0x3   :  { %s212_s12 = smov 2  }
   0x4   :  { %20 = dma.hbm_to_vmem [thread:$0]  %s13_s8, 96, %s15_s10, [#allocation3], %s211_s11, %s211_s11, %s212_s12  }
   0x5   :  { %206 = dma.done.wait [#allocation3], 96  }
   0x6   :  { %207 = vsyncadd [#allocation3], 4294967200  ;;  %v30_v0 = vld [vmem:[#allocation2] sm:$0x3]  ;;  %v32_v1 = vld [vmem:[#allocation2 + $0x2] sm:$0x3]  ;;  %v105_v58 = vlaneseq }
   0x7   :  { %v34_v2 = vld [vmem:[#allocation2 + $0x4] sm:$0x3]  ;;  %v35_v3 = vsub.f32 %v30_v0, %v32_v1  ;;  %vm38_vm0 = vcmask 254976   ;;  %vm73_vm5 = vcmask 1024   ;;  %s213_s15 = smov [#allocation5]   ;;  %s133_s19 = sshll.u32 %s231_s1, 4  ;;  %s134_s19 = int_to_ptr.hbm [resolvable:$true] %s133_s19 }
   0x8   :  { %v36_v5 = vsub.f32 %v30_v0, %v34_v2  ;;  %v106_v59 = vand.u32 127, %v105_v58  ;;  %s131_s16 = sshll.u32 %s213_s15, 4  ;;  %s132_s16 = int_to_ptr.vmem [resolvable:$true] %s131_s16 }
   0x9   :  { %v37_v4 = vmul.f32 %v35_v3, %v35_v3 }
   0xa   :  { %v54_v7 = vmul.f32 %v36_v5, %v36_v5  ;;  %vm107_vm6 = vcmp.eq.s32.totalorder %v106_v59, 0  ;;  %vm110_vm7 = vcmp.eq.s32.totalorder %v106_v59, 1  ;;  %vm114_vm8 = vcmp.eq.s32.totalorder %v106_v59, 2 }
   0xb   :  { %v39_v6 = vsel %vm38_vm0, %v37_v4, 0.0 }
   0xc   :  { %40 = vadd.xlane.f32.xlu0 %v39_v6  ;;  %v55_v8 = vsel %vm38_vm0, %v54_v7, 0.0 }
  0x14   :  { %56 = vadd.xlane.f32.xlu0 %v55_v8 }
  0x7f   :  { %v41_v9 = vpop.xlane.xlu0 %40 }
  0x80   :  { %154 = vrsqrt.f32 %v41_v9  ;;  %vm49_vm1 = vcmp.eq.f32.partialorder %v41_v9, inf  ;;  %v52_v26 = vand.u32 2147483648, %v41_v9  ;;  %vm51_vm3 = vcmp.eq.f32.partialorder %v41_v9, 0.0 }
  0x86   :  { %v155_v10 = vpop.eup %154 }
  0x87   :  { %v43_v11 = vmul.f32 %v155_v10, %v41_v9  ;;  %v57_v12 = vpop.xlane.xlu0 %56 }
  0x88   :  { %156 = vrsqrt.f32 %v57_v12  ;;  %vm65_vm2 = vcmp.eq.f32.partialorder %v57_v12, inf  ;;  %v68_v27 = vand.u32 2147483648, %v57_v12  ;;  %vm67_vm4 = vcmp.eq.f32.partialorder %v57_v12, 0.0 }
  0x89   :  { %v44_v13 = vmul.f32 %v155_v10, %v43_v11 }
  0x8b   :  { %v45_v14 = vmul.f32 0.5, %v44_v13 }
  0x8d   :  { %v46_v15 = vsub.f32 1.5, %v45_v14 }
  0x8e   :  { %v157_v16 = vpop.eup %156 }
  0x8f   :  { %v59_v17 = vmul.f32 %v157_v16, %v57_v12  ;;  %v47_v18 = vmul.f32 %v155_v10, %v46_v15 }
  0x91   :  { %v60_v19 = vmul.f32 %v157_v16, %v59_v17  ;;  %v48_v21 = vmul.f32 %v47_v18, %v41_v9 }
  0x93   :  { %v61_v20 = vmul.f32 0.5, %v60_v19  ;;  %v50_v24 = vsel %vm49_vm1, %v41_v9, %v48_v21 }
  0x94   :  { %v53_v29 = vsel %vm51_vm3, %v52_v26, %v50_v24 }
  0x95   :  { %v62_v22 = vsub.f32 1.5, %v61_v20  ;;  %v84_v36 = vsel %vm73_vm5, %v53_v29, 0.0 }
  0x97   :  { %v63_v23 = vmul.f32 %v157_v16, %v62_v22 }
  0x99   :  { %v64_v25 = vmul.f32 %v63_v23, %v57_v12 }
  0x9b   :  { %v66_v28 = vsel %vm65_vm2, %v57_v12, %v64_v25 }
  0x9c   :  { %v69_v30 = vsel %vm67_vm4, %v68_v27, %v66_v28 }
  0x9d   :  { %v94_v31 = vsel %vm73_vm5, %v69_v30, 0.0  ;;  %v70_v32 = vsub.f32 %v53_v29, %v69_v30 }
  0x9e   :  { %95 = vadd.xlane.f32.xlu2 %v94_v31 }
  0x9f   :  { %v71_v33 = vadd.f32 1.0, %v70_v32 }
  0xa1   :  { %v72_v34 = vmax.f32 %v71_v33, 0.0 }
  0xa3   :  { %v74_v35 = vsel %vm73_vm5, %v72_v34, 0.0 }
  0xa4   :  { %75 = vadd.xlane.f32.xlu1 %v74_v35 }
  0xac   :  { %85 = vadd.xlane.f32.xlu1 %v84_v36 }
 0x111   :  { %v96_v37 = vpop.xlane.xlu2 %95 }
 0x112   :  { %v97_v38 = vrot.slane %v96_v37, 4 }
 0x114   :  { %v98_v42 = vadd.f32 %v97_v38, %v96_v37 }
 0x116   :  { %v99_v45 = vrot.slane %v98_v42, 2 }
 0x117   :  { %v76_v39 = vpop.xlane.xlu1 %75 }
 0x118   :  { %v77_v40 = vrot.slane %v76_v39, 4  ;;  %v100_v51 = vadd.f32 %v99_v45, %v98_v42 }
 0x11a   :  { %v78_v41 = vadd.f32 %v77_v40, %v76_v39  ;;  %v101_v54 = vrot.slane %v100_v51, 1 }
 0x11c   :  { %v79_v43 = vrot.slane %v78_v41, 2  ;;  %v102_v57 = vadd.f32 %v101_v54, %v100_v51 }
 0x11e   :  { %v80_v44 = vadd.f32 %v79_v43, %v78_v41 }
 0x11f   :  { %v86_v46 = vpop.xlane.xlu1 %85 }
 0x120   :  { %v87_v47 = vrot.slane %v86_v46, 4  ;;  %v81_v48 = vrot.slane %v80_v44, 1 }
 0x122   :  { %v88_v49 = vadd.f32 %v87_v47, %v86_v46  ;;  %v82_v50 = vadd.f32 %v81_v48, %v80_v44 }
 0x124   :  { %v89_v52 = vrot.slane %v88_v49, 2  ;;  %143 = vpush %v82_v50 }
 0x126   :  { %v90_v53 = vadd.f32 %v89_v52, %v88_v49 }
 0x128   :  { %v91_v55 = vrot.slane %v90_v53, 1 }
 0x12a   :  { %v92_v56 = vadd.f32 %v91_v55, %v90_v53 }
 0x12c   :  { %145 = vpush %v92_v56 }
 0x12d   :  { %147 = vpush %v102_v57 }
 0x155   :  { %s144_s0 = spop %143 }
 0x156   :  { %v108_v60 = vstv %s144_s0 }
 0x157   :  { %v109_v62 = vsel %vm107_vm6, %v108_v60, 0.0 }
 0x15d   :  { %s146_s13 = spop %145 }
 0x15e   :  { %v111_v61 = vstv %s146_s13  ;;  %s148_s14 = spop %147 }
 0x15f   :  { %v112_v63 = vsel %vm110_vm7, %v111_v61, 0.0  ;;  %v115_v0 = vstv %s148_s14 }
 0x160   :  { %v113_v1 = vadd.f32 %v112_v63, %v109_v62  ;;  %v116_v2 = vsel %vm114_vm8, %v115_v0, 0.0 }
 0x162   :  { %v117_v3 = vadd.f32 %v116_v2, %v113_v1 }
 0x164   :  { %v124_v4 = vmul.f32 0.5, %v117_v3 }
 0x166   :  { %125 = vst [vmem:[#allocation5] sm:$0xff] %v124_v4 }
 0x167   :  { %136 = dma.vmem_to_hbm [thread:$0]  %s132_s16, 128, %s134_s19, [#allocation4]  }
 0x168   :  { %208 = dma.done.wait [#allocation4], 128  }
 0x169   :  { %209 = vsyncadd [#allocation4], 4294967168 }
 0x16a   :  { %141 = vsyncpa [#allocation3], 1 }
 0x16b   :  { %142 = vsyncpa [#allocation4], 1 }

</bundles_post_ra>
